<compile_context>
chip_gen: v7x
topology: tpu7x:2x2x1
jax: 0.10.0
libtpu: 0.0.40
codegen_flags: <defaults>
</compile_context>

<pallas_src>
import functools

import jax
import jax.numpy as jnp
from jax.experimental import pallas as pl
from jax.experimental.pallas import tpu as pltpu


def _pick_tile(n, target, align):
    """Largest tile t <= target with t % align == 0 and n % t == 0 (n if n <= target)."""
    if n <= target:
        return n
    t = (target // align) * align
    while t >= align:
        if n % t == 0:
            return t
        t -= align
    return n  # no aligned divisor; fall back to the full dim


# ----------------------------------------------------------------------------
# Kernel 1: pix_feat_with_mem = vision_feat + no_mem_embed, permute(1,2,0) fused.
# Grid = (B, C-tiles, HW-tiles), all "parallel"; kernel block is 2-D (HWt, Ct),
# batch never enters the sublane slot.
# ----------------------------------------------------------------------------
def _add_no_mem_permute_kernel(feat_ref, emb_ref, out_ref):
    """feat_ref: (HWt, Ct); emb_ref: (1, Ct); out_ref: (Ct, HWt)."""
    # Add (broadcast over HWt rows) then a small 2-D transpose (XLU) per tile;
    # at 512x128 tiles the transpose interleaves with DMA of the next tile.
    out_ref[...] = (feat_ref[...] + emb_ref[...]).T.astype(out_ref.dtype)


def add_no_mem_embed(vision_feat, no_mem_embed, feat_hw):
    """vision_feat: (HW, B, C) seq-first; no_mem_embed: (1, 1, C).

    Returns (B, C, H, W) exactly like
      (feat + no_mem_embed).permute(1, 2, 0).view(B, C, H, W).
    """
    HW, B, C = vision_feat.shape
    H, W = feat_hw
    assert HW == H * W
    emb2d = no_mem_embed.reshape(1, C)
    HWt = _pick_tile(HW, target=512, align=128)
    nH = HW // HWt

    if C % 128 == 0:
        # Primary path (real SAM2: C = 256).  Merge (B, C) into one lane axis
        # with a FREE reshape, so each block is a dense (HWt, 128) slab and the
        # batch index only appears in the column block offset.
        Ct = 128
        nC = C // Ct
        feat_arg = vision_feat.reshape(HW, B * C)  # free view, no data movement
        feat_spec = pl.BlockSpec((HWt, Ct), lambda b, c, h: (h, b * nC + c))
    else:
        # Fallback: full-C lane block, batch squeezed out of the sublane slot.
        Ct = C
        nC = 1
        feat_arg = vision_feat
        feat_spec = pl.BlockSpec((HWt, None, Ct), lambda b, c, h: (h, b, 0))

    out3d = pl.pallas_call(
        _add_no_mem_permute_kernel,
        out_shape=jax.ShapeDtypeStruct((B, C, HW), vision_feat.dtype),
        grid=(B, nC, nH),                      # innermost axis walks HW tiles
        in_specs=[
            feat_spec,
            pl.BlockSpec((1, Ct), lambda b, c, h: (0, c)),
        ],
        out_specs=pl.BlockSpec((None, Ct, HWt), lambda b, c, h: (b, c, h)),
        compiler_params=pltpu.CompilerParams(
            dimension_semantics=("parallel", "parallel", "parallel")),
    )(feat_arg, emb2d)

    # (B, C, HW) -> (B, C, H, W): trailing-dim split, free.
    return out3d.reshape(B, C, H, W)


# ----------------------------------------------------------------------------
# Kernel 2: mask_downsample = Conv2d(1, 1, 4, stride=4) as a VPU weighted sum
# of 16 stride-4 planes over a lane-dense flattened output slab, row-tiled.
# ----------------------------------------------------------------------------
def _mask_downsample_kernel(planes_ref, w_ref, b_ref, out_ref):
    """planes_ref: (16, Rt, L); w_ref: SMEM (16,); b_ref: SMEM (1,); out_ref: (Rt, L)."""
    acc = planes_ref[0] * w_ref[0]
    for k in range(1, 16):                      # memory-bound; serial chain is hidden
        acc = acc + planes_ref[k] * w_ref[k]
    out_ref[...] = (acc + b_ref[0]).astype(out_ref.dtype)


def mask_downsample(mask_inputs, conv_w, conv_b):
    """mask_inputs: (B, 1, H, W); conv_w: (1, 1, 4, 4); conv_b: (1,).

    Returns F.conv2d(mask_inputs, conv_w, conv_b, stride=4) as (B, 1, H//4, W//4).
    """
    B, _, H, W = mask_inputs.shape
    assert H % 4 == 0 and W % 4 == 0
    Ho, Wo = H // 4, W // 4
    n_out = B * Ho * Wo

    # 16 stride-4 planes; k = kh*4 + kw matches the OIHW weight flatten order.
    planes = jnp.stack(
        [mask_inputs[:, 0, kh::4, kw::4].reshape(-1)
         for kh in range(4) for kw in range(4)],
        axis=0,
    )  # (16, B*Ho*Wo)

    # Lane-dense slab: the 16-tap weighted sum is elementwise per output element,
    # so the flattening is layout-free and avoids masked stores when Wo < 128.
    if n_out % 128 == 0:
        R, L = n_out // 128, 128
    else:
        R, L = B * Ho, Wo  # correctness fallback (masked lane stores, slower)
    planes = planes.reshape(16, R, L)

    Rt = _pick_tile(R, target=256, align=8)
    out_flat = pl.pallas_call(
        _mask_downsample_kernel,
        out_shape=jax.ShapeDtypeStruct((R, L), jnp.float32),
        grid=(R // Rt,),
        in_specs=[
            pl.BlockSpec((16, Rt, L), lambda r: (0, r, 0)),
            pl.BlockSpec(memory_space=pltpu.MemorySpace.SMEM),   # conv weights
            pl.BlockSpec(memory_space=pltpu.MemorySpace.SMEM),   # conv bias
        ],
        out_specs=pl.BlockSpec((Rt, L), lambda r: (r, 0)),
        compiler_params=pltpu.CompilerParams(dimension_semantics=("parallel",)),
    )(planes, conv_w.reshape(16), conv_b)

    return out_flat.reshape(B, 1, Ho, Wo)


# ----------------------------------------------------------------------------
# Kernel 3: mask_for_mem = sigmoid(pred_masks) * scale + bias on a lane-dense
# (rows, 128) slab, row-tiled; scale/bias are SMEM scalars (no recompilation).
# ----------------------------------------------------------------------------
def _sigmoid_scale_bias_kernel(pred_ref, sb_ref, out_ref):
    """pred_ref/out_ref: (Rt, L); sb_ref: SMEM (2,) = [scale, bias]."""
    y = jax.nn.sigmoid(pred_ref[...])           # runs in input dtype (bf16 on v6e/v7x)
    out_ref[...] = (y * sb_ref[0] + sb_ref[1]).astype(out_ref.dtype)


def mask_for_mem_enc(pred_masks, sigmoid_scale, sigmoid_bias):
    """pred_masks: (B, 1, Hp, Wp). Returns sigmoid(pred) * scale + bias, same shape/dtype."""
    shape = pred_masks.shape
    total = 1
    for s in shape:
        total *= s
    if total % 128 == 0:
        R, L = total // 128, 128
    else:
        R, L = total // shape[-1], shape[-1]
    pred_flat = pred_masks.reshape(R, L)
    sb = jnp.asarray([sigmoid_scale, sigmoid_bias], dtype=jnp.float32)

    Rt = _pick_tile(R, target=1024, align=8)
    out_flat = pl.pallas_call(
        _sigmoid_scale_bias_kernel,
        out_shape=jax.ShapeDtypeStruct((R, L), pred_masks.dtype),
        grid=(R // Rt,),
        in_specs=[
            pl.BlockSpec((Rt, L), lambda r: (r, 0)),
            pl.BlockSpec(memory_space=pltpu.MemorySpace.SMEM),   # [scale, bias]
        ],
        out_specs=pl.BlockSpec((Rt, L), lambda r: (r, 0)),
        compiler_params=pltpu.CompilerParams(dimension_semantics=("parallel",)),
    )(pred_flat, sb)

    return out_flat.reshape(shape)


def mask_prep(mask_inputs, conv_w, conv_b, pred_masks, sigmoid_scale, sigmoid_bias):
    """Convenience wrapper: mask_downsample + memory-encoder mask prep."""
    mask_ds = mask_downsample(mask_inputs, conv_w, conv_b)
    mem = mask_for_mem_enc(pred_masks, sigmoid_scale, sigmoid_bias)
    return mask_ds, mem


# ----------------------------------------------------------------------------
# Deterministic parameter init (shapes from SAM2Model.__init__)
# ----------------------------------------------------------------------------
def init_params(key, hidden_dim, mem_dim, num_maskmem):
    k = jax.random.split(key, 6)
    tn = lambda kk, shape: 0.02 * jax.random.truncated_normal(
        kk, -2.0, 2.0, shape, dtype=jnp.float32
    )
    return {
        "maskmem_tpos_enc": tn(k[0], (num_maskmem, 1, 1, mem_dim)),
        "no_mem_embed": tn(k[1], (1, 1, hidden_dim)),
        "no_mem_pos_enc": tn(k[2], (1, 1, hidden_dim)),
        # Conv2d(1, 1, 4, 4): torch default init ~ U(-1/sqrt(16), 1/sqrt(16))
        "mask_downsample_w": jax.random.uniform(
            k[3], (1, 1, 4, 4), jnp.float32, -0.25, 0.25
        ),
        "mask_downsample_b": jax.random.uniform(k[4], (1,), jnp.float32, -0.25, 0.25),
    }


# ----------------------------------------------------------------------------
# Main
# ----------------------------------------------------------------------------
if __name__ == "__main__":
    key = jax.random.PRNGKey(0)
    kp, k1, k2, k3 = jax.random.split(key, 4)

    # Small synthetic shapes consistent with SAM2's conventions
    B = 2
    hidden_dim = 128      # memory_attention.d_model (128-aligned, like real SAM2's 256)
    mem_dim = 64
    num_maskmem = 7
    feat_h = feat_w = 16  # lowest-res backbone feature map
    HW = feat_h * feat_w
    mask_h = mask_w = 64  # mask input resolution (divisible by 4)
    sigmoid_scale_for_mem_enc = 20.0   # typical SAM2 config values
    sigmoid_bias_for_mem_enc = -10.0

    params = init_params(kp, hidden_dim, mem_dim, num_maskmem)

    # current_vision_feats[-1]: (HW, B, C) seq-first, as SAM2 stores them
    vision_feat = jax.random.normal(k1, (HW, B, hidden_dim), dtype=jnp.float32)
    # mask input for mask_downsample: NCHW
    mask_inputs = jax.random.normal(k2, (B, 1, mask_h, mask_w), dtype=jnp.float32)
    # predicted masks for memory encoding: NCHW
    pred_masks = jax.random.normal(k3, (B, 1, feat_h, feat_w), dtype=jnp.float32)

    # (1) no-memory conditioning (directly_add_no_mem_embed path), permute fused
    pix_feat_with_mem = add_no_mem_embed(
        vision_feat, params["no_mem_embed"], (feat_h, feat_w)
    )
    # (2)+(3) mask preparation (row-tiled, pipelined kernels)
    mask_ds, mask_for_mem = mask_prep(
        mask_inputs,
        params["mask_downsample_w"],
        params["mask_downsample_b"],
        pred_masks,
        sigmoid_scale_for_mem_enc,
        sigmoid_bias_for_mem_enc,
    )

    jax.block_until_ready((pix_feat_with_mem, mask_ds, mask_for_mem))

    # lightweight reference checks (pure JAX)
    ref1 = jnp.transpose(
        vision_feat + params["no_mem_embed"], (1, 2, 0)
    ).reshape(B, hidden_dim, feat_h, feat_w)
    ref2 = (
        jax.lax.conv_general_dilated(
            mask_inputs,
            params["mask_downsample_w"],
            window_strides=(4, 4),
            padding="VALID",
            dimension_numbers=("NCHW", "OIHW", "NCHW"),
        )
        + params["mask_downsample_b"].reshape(1, 1, 1, 1)
    )
    ref3 = (
        jax.nn.sigmoid(pred_masks) * sigmoid_scale_for_mem_enc
        + sigmoid_bias_for_mem_enc
    )

    assert jnp.allclose(pix_feat_with_mem, ref1, atol=1e-5)
    assert jnp.allclose(mask_ds, ref2, atol=1e-5)
    assert jnp.allclose(mask_for_mem, ref3, atol=1e-4)

    print("KERNEL_OK")
</pallas_src>

<mosaic_0001>
module attributes {stable_mosaic.version = 11 : i64} {
  func.func @_add_no_mem_permute_kernel(%arg0: i32, %arg1: i32, %arg2: i32, %arg3: memref<256x128xf32, #tpu.memory_space<vmem>>, %arg4: memref<1x128xf32, #tpu.memory_space<vmem>>, %arg5: memref<1x128x256xf32, #tpu.memory_space<vmem>>) attributes {dimension_semantics = [#tpu.dimension_semantics<parallel>, #tpu.dimension_semantics<parallel>, #tpu.dimension_semantics<parallel>], iteration_bounds = array<i64: 2, 1, 1>, scalar_prefetch = 0 : i64, scratch_operands = 0 : i64, tpu.core_type = #tpu.core_type<tc>, window_params = [{transform_indices = @transform_0, window_bounds = array<i64: 256, 128>}, {transform_indices = @transform_1, window_bounds = array<i64: 1, 128>}, {transform_indices = @transform_2, window_bounds = array<i64: 1, 128, 256>}]} {
    %c0 = arith.constant 0 : index
    %c0_0 = arith.constant 0 : index
    %0 = vector.load %arg3[%c0, %c0_0] : memref<256x128xf32, #tpu.memory_space<vmem>>, vector<256x128xf32>
    %c0_1 = arith.constant 0 : index
    %c0_2 = arith.constant 0 : index
    %1 = vector.load %arg4[%c0_1, %c0_2] : memref<1x128xf32, #tpu.memory_space<vmem>>, vector<1x128xf32>
    %2 = vector.broadcast %1 : vector<1x128xf32> to vector<256x128xf32>
    %3 = arith.addf %0, %2 : vector<256x128xf32>
    %4 = tpu.transpose %3, [1, 0] : vector<256x128xf32> -> vector<128x256xf32>
    %c0_3 = arith.constant 0 : index
    %c0_4 = arith.constant 0 : index
    %c0_5 = arith.constant 0 : index
    %5 = vector.load %arg5[%c0_3, %c0_4, %c0_5] : memref<1x128x256xf32, #tpu.memory_space<vmem>>, vector<1x128x256xf32>
    %6 = vector.shape_cast %5 : vector<1x128x256xf32> to vector<128x256xf32>
    %7 = vector.shape_cast %4 : vector<128x256xf32> to vector<1x128x256xf32>
    tpu.vector_store %arg5[%c0_3, %c0_4, %c0_5], %7 {strides = array<i32>} : memref<1x128x256xf32, #tpu.memory_space<vmem>>, vector<1x128x256xf32>,
    return
  }
  func.func @transform_0(%arg0: i32, %arg1: i32, %arg2: i32) -> (i32, i32) {
    %c1_i32 = arith.constant 1 : i32
    %0 = arith.muli %arg0, %c1_i32 : i32
    %1 = arith.addi %0, %arg1 : i32
    %c0_i32 = arith.constant 0 : i32
    return %arg2, %1 : i32, i32
  }
  func.func @transform_1(%arg0: i32, %arg1: i32, %arg2: i32) -> (i32, i32) {
    %c0_i32 = arith.constant 0 : i32
    %c0_i32_0 = arith.constant 0 : i32
    return %c0_i32, %arg1 : i32, i32
  }
  func.func @transform_2(%arg0: i32, %arg1: i32, %arg2: i32) -> (i32, i32, i32) {
    %c0_i32 = arith.constant 0 : i32
    return %arg0, %arg1, %arg2 : i32, i32, i32
  }
}

</mosaic_0001>

<bundles_post_ra>
// kernel: tpu_custom_call.1
= control target key start
LH: loop header
LB: loop body
LE: loop exit
PB: predicated region body
PF: predicated region fallthrough
CT: control target
= control target key end

     0   :  { %7 = vsyncpa [#allocation3], 0  ;;  %s1003_s0 = inlined_call_operand.hbm [shape: f32[256,256], index: 0, kind: input, shape index: {}]   ;;  %s1004_s1 = inlined_call_operand.vmem [shape: f32[1,128], index: 1, kind: input, shape index: {}]   ;;  %s1005_s2 = inlined_call_operand.hbm [shape: f32[2,128,256], index: 2, kind: output, shape index: {}]  }
   0x1   :  { %9 = vsyncpa [#allocation3 + $0x1], 0 }
   0x2   :  { %10 = vsyncpa [#allocation4], 0 }
   0x3   :  { %12 = vsyncpa [#allocation4 + $0x1], 0  ;;  %s720_s9 = smov 0   ;;  %s722_s10 = smov 0  }
   0x4   :  { %s724_s11 = smov 0   ;;  %s726_s12 = smov 0  }
   0x5   :  { %s728_s13 = smov 0   ;;  %s730_s14 = smov 0  }
   0x6 LB: > { %s500_s15 = sadd.s32 4294967295, %s696_s14   ;;  %s501_s16 = sadd.s32 4294967294, %s696_s14   ;;  %s696_s14 = sphi %s730_s14, %s18_s14   ;;  %s692_s13 = sphi %s728_s13, %s1019_s13   ;;  %s688_s12 = sphi %s726_s12, %s1018_s12   ;;  %s684_s11 = sphi %s724_s11, %s1017_s11   ;;  %s680_s10 = sphi %s722_s10, %s1016_s10   ;;  %s676_s9 = sphi %s720_s9, %s1015_s9  }
   0x7   : > { %s37_s17 = sadd.s32 1, %s692_s13  ;;  %s48_s18 = sadd.s32 1, %s684_s11 }
   0x8   : > { %p39_p0 = scmp.ge.s32.totalorder %s37_s17, 2  ;;  %p55_p1 = scmp.ne.s32.totalorder %s684_s11, %s680_s10 }
   0x9   : > { %p56_p2 = scmp.eq.s32.totalorder %s696_s14, 0  ;;  %p61_p3 = scmp.ne.s32.totalorder %s680_s10, %s676_s9 }
   0xa   : > { %s1021_s17 = smov (%p39_p0, %s37_s17), 0  ;;  %p62_p5 = scmp.eq.s32.totalorder %s500_s15, 0 }
   0xb   : > { %p761_p4 = por %p56_p2, %p55_p1  ;;  %s44_s20 = ssub.s32 %s692_s13, %s1021_s17 }
   0xc   : > { %p115_p6 = scmp.eq.s32.totalorder %s500_s15, 1  ;;  %p46_p7 = scmp.eq.s32.totalorder %s44_s20, 0 }
   0xd   : > { %p767_p8 = por %p62_p5, %p61_p3  ;;  %p121_p10 = scmp.eq.s32.totalorder %s501_s16, 1 }
   0xe   : > { %p771_p9 = por %p115_p6, %p55_p1  ;;  %p529_p13 = scmp.lt.s32.totalorder %s696_s14, 2 }
   0xf   : > { %s776_s23 = scalar_select %p46_p7, %s684_s11, %s48_s18  }
  0x10   : > { %s1009_s22 = scalar_select %p771_p9, 1, 0 }
  0x11   : > { %p778_p11 = por %p121_p10, %p61_p3  ;;  %s147_s25 = sand.u32 1, %s684_s11  }
  0x12   : > { %s505_s26 = sshll.u32 %s147_s25, 8  ;;  %s506_s27 = sshll.u32 %s692_s13, 7 }
  0x13   : > { %s1010_s24 = scalar_select %p778_p11, 1, 0 }
  0x14   : > { %s789_s30 = scalar_lea.hbm %s1003_s0, %s506_s27  ;;  %s151_s3 = scalar_lea.vmem [#allocation2], %s505_s26 }
  0x15   : > { %s161_s4 = sshll.u32 %s151_s3, 4  ;;  %p795_p0 = pnand %p529_p13, %p761_p4  ;;  %s791_s4 = int_to_ptr.vmem [resolvable:$true] %s161_s4 }
  0x16   : > { %s799_s6 = scalar_lea.sflag [#allocation3], %s147_s25  ;;  %s584_s7 = scalar_lea.hbm %s789_s30, 4096 }
  0x17   : > { %p585_p1 = scmp.ne.s32.totalorder %s789_s30, %s584_s7  ;;  %p586_p2 = pneg %p795_p0 }
  0x18   : > { %s589_s16 = scalar_lea.hbm %s1003_s0, 8192  ;;  %p590_p4 = scmp.lt.u32.totalorder %s789_s30, %s1003_s0 }
  0x19   : > { %p587_p3 = pnand %p586_p2, %p585_p1  ;;  %p591_p6 = scmp.lt.u32.totalorder %s589_s16, %s584_s7 }
  0x1a   : > { %p593_p10 = scmp.lt.u32.totalorder %s584_s7, %s789_s30 }
  0x1b   : > { %p588_p5 = pneg %p587_p3  ;;  %p592_p7 = por %p591_p6, %p590_p4 }
  0x1d   : > { %p594_p13 = por %p593_p10, %p592_p7 }
  0x1f   : > { %p595_p12 = pnand %p594_p13, %p588_p5 }
  0x21   : > { %598 = shalt.err (!%p595_p12)
}
  0x22   : > { %s599_s20 = scalar_lea.vmem %s791_s4, 4096  ;;  %s698_s25 = smov [#allocation2]  }
  0x23   : > { %p600_p1 = scmp.ne.s32.totalorder %s791_s4, %s599_s20  ;;  %s604_s26 = sshll.u32 %s698_s25, 4  ;;  %s605_s26 = int_to_ptr.vmem [resolvable:$false] %s604_s26 }
  0x24   : > { %s606_s27 = scalar_lea.vmem %s605_s26, 8192  ;;  %p607_p9 = scmp.lt.s32.totalorder %s791_s4, %s605_s26 }
  0x25   : > { %p602_p3 = pnand %p600_p1, %p586_p2  ;;  %p608_p4 = scmp.lt.s32.totalorder %s606_s27, %s599_s20 }
  0x27   : > { %p603_p11 = pneg %p602_p3  ;;  %p609_p6 = por %p608_p4, %p607_p9 }
  0x29   : > { %p610_p7 = pnand %p609_p6, %p603_p11 }
  0x2b   : > { %613 = shalt.err (!%p610_p7)
}
  0x2c   : > { %s699_s28 = smov 256   ;;  %s700_s29 = smov 128  }
  0x2d   : > { %s701_s3 = smov 8   ;;  %p507_p12 = scmp.ge.s32.totalorder %s696_s14, 1 }
  0x2e   : > { %524 = dma.hbm_to_vmem [thread:$0]  (!%p795_p0), %s789_s30, 4096, %s791_s4, %s799_s6, %s699_s28, %s700_s29, %s701_s3  }
  0x2f   : > { %p169_p2 = scmp.lt.s32.totalorder %s696_s14, 3 }
  0x31   : > { %p170_p5 = pnand %p507_p12, %p169_p2 }
  0x32   : > { %s830_s7 = sand.u32 (!%p170_p5), 1, %s680_s10  }
  0x33   : > { %173 = sbr.rel (%p170_p5) target bundleno = 268 (0x10c), region = 28  ;;  %s508_s8 = sshll.u32 (!%p170_p5), %s830_s7, 8 }
  0x34   : > { %s176_s15 = scalar_lea.sflag (!%p170_p5), [#allocation3], %s830_s7  ;;  %s836_s16 = scalar_lea.vmem (!%p170_p5), [#allocation2], %s508_s8 }
  0x3a   : > { %667 = dma.done.wait (%p767_p8), %s176_s15, 4096  }
  0x3b   : > { %669 = vsyncadd (%p767_p8), %s176_s15, 4294963200  ;;  %v226_v0 = vld [vmem:[%s836_s16 + $0x80] sm:$0xff]  ;;  %v227_v5 = vld [vmem:[%s836_s16 + $0x88] sm:$0xff]  ;;  %s913_s21 = scalar_lea.vmem [#allocation5], %s508_s8  ;;  %s516_s5 = sshll.u32 %s688_s12, 12 }
  0x3c   : > { %v846_v1 = vld [vmem:[%s1004_s1] ss:$0 sm:$0xff]  ;;  %v211_v6 = vld [vmem:[%s836_s16 + $0x8] sm:$0xff]  ;;  %v228_v9 = vld [vmem:[%s836_s16 + $0x90] sm:$0xff]  ;;  %s396_s6 = sshll.u32 %s913_s21, 4  ;;  %s950_s20 = scalar_lea.hbm %s1005_s2, %s516_s5  ;;  %s952_s6 = int_to_ptr.vmem [resolvable:$true] %s396_s6 }
  0x3d   : > { %v210_v2 = vld [vmem:[%s836_s16] sm:$0xff]  ;;  %v265_v3 = vadd.f32 %v846_v1, %v226_v0  ;;  %v266_v7 = vadd.f32 %v846_v1, %v227_v5  ;;  %v250_v8 = vadd.f32 %v846_v1, %v211_v6  ;;  %v212_v10 = vld [vmem:[%s836_s16 + $0x10] sm:$0xff]  ;;  %v267_v11 = vadd.f32 %v846_v1, %v228_v9  ;;  %v229_v13 = vld [vmem:[%s836_s16 + $0x98] sm:$0xff]  ;;  %s378_s12 = scalar_lea.sflag [#allocation4], %s830_s7  ;;  %s614_s25 = scalar_lea.vmem %s952_s6, 4096 }
  0x3e   : > { %v249_v4 = vadd.f32 %v846_v1, %v210_v2  ;;  %v251_v12 = vadd.f32 %v846_v1, %v212_v10  ;;  %v213_v14 = vld [vmem:[%s836_s16 + $0x18] sm:$0xff]  ;;  %v268_v15 = vadd.f32 %v846_v1, %v229_v13  ;;  %v230_v17 = vld [vmem:[%s836_s16 + $0xa0] sm:$0xff]  ;;  %v231_v21 = vld [vmem:[%s836_s16 + $0xa8] sm:$0xff]  ;;  %p615_p8 = scmp.ne.s32.totalorder %s952_s6, %s614_s25  ;;  %p1012_p9 = scmp.ne.s32.totalorder %s1009_s22, 0 }
  0x3f   : > { %313 = vxpose.xlu1.b32.start [1/16] %v265_v3, 128  ;;  %v252_v16 = vadd.f32 %v846_v1, %v213_v14  ;;  %v214_v18 = vld [vmem:[%s836_s16 + $0x20] sm:$0xff]  ;;  %v269_v19 = vadd.f32 %v846_v1, %v230_v17  ;;  %v215_v22 = vld [vmem:[%s836_s16 + $0x28] sm:$0xff]  ;;  %v270_v23 = vadd.f32 %v846_v1, %v231_v21  ;;  %v232_v25 = vld [vmem:[%s836_s16 + $0xb0] sm:$0xff]  ;;  %s702_s26 = smov [#allocation5]  }
  0x40   : > { %281 = vxpose.xlu0.b32.start [1/16] %v249_v4, 128  ;;  %v253_v20 = vadd.f32 %v846_v1, %v214_v18  ;;  %v254_v24 = vadd.f32 %v846_v1, %v215_v22  ;;  %v216_v26 = vld [vmem:[%s836_s16 + $0x30] sm:$0xff]  ;;  %v271_v27 = vadd.f32 %v846_v1, %v232_v25  ;;  %v233_v29 = vld [vmem:[%s836_s16 + $0xb8] sm:$0xff]  ;;  %v234_v33 = vld [vmem:[%s836_s16 + $0xc0] sm:$0xff]  ;;  %p616_p11 = pnand %p615_p8, %p1012_p9  ;;  %s618_s27 = sshll.u32 %s702_s26, 4  ;;  %s619_s27 = int_to_ptr.vmem [resolvable:$false] %s618_s27 }
  0x41   : > { %v255_v28 = vadd.f32 %v846_v1, %v216_v26  ;;  %v217_v30 = vld [vmem:[%s836_s16 + $0x38] sm:$0xff]  ;;  %v272_v31 = vadd.f32 %v846_v1, %v233_v29  ;;  %v218_v34 = vld [vmem:[%s836_s16 + $0x40] sm:$0xff]  ;;  %v273_v35 = vadd.f32 %v846_v1, %v234_v33  ;;  %v235_v37 = vld [vmem:[%s836_s16 + $0xc8] sm:$0xff]  ;;  %s620_s28 = scalar_lea.vmem %s619_s27, 8192  ;;  %p621_p10 = scmp.lt.s32.totalorder %s952_s6, %s619_s27 }
  0x42   : > { %v256_v32 = vadd.f32 %v846_v1, %v217_v30  ;;  %v257_v36 = vadd.f32 %v846_v1, %v218_v34  ;;  %v219_v38 = vld [vmem:[%s836_s16 + $0x48] sm:$0xff]  ;;  %v274_v39 = vadd.f32 %v846_v1, %v235_v37  ;;  %v236_v41 = vld [vmem:[%s836_s16 + $0xd0] sm:$0xff]  ;;  %v237_v45 = vld [vmem:[%s836_s16 + $0xd8] sm:$0xff]  ;;  %p617_p0 = pneg %p616_p11  ;;  %p622_p13 = scmp.lt.s32.totalorder %s620_s28, %s614_s25 }
  0x43   : > { %314 = vxpose.xlu1.b32.cont [2/16] %v266_v7, 128  ;;  %v258_v40 = vadd.f32 %v846_v1, %v219_v38  ;;  %v220_v42 = vld [vmem:[%s836_s16 + $0x50] sm:$0xff]  ;;  %v275_v43 = vadd.f32 %v846_v1, %v236_v41  ;;  %v221_v46 = vld [vmem:[%s836_s16 + $0x58] sm:$0xff]  ;;  %v276_v47 = vadd.f32 %v846_v1, %v237_v45  ;;  %v238_v49 = vld [vmem:[%s836_s16 + $0xe0] sm:$0xff] }
  0x44   : > { %282 = vxpose.xlu0.b32.cont [2/16] %v250_v8, 128  ;;  %v259_v44 = vadd.f32 %v846_v1, %v220_v42  ;;  %v260_v48 = vadd.f32 %v846_v1, %v221_v46  ;;  %v222_v50 = vld [vmem:[%s836_s16 + $0x60] sm:$0xff]  ;;  %v277_v51 = vadd.f32 %v846_v1, %v238_v49  ;;  %v239_v53 = vld [vmem:[%s836_s16 + $0xe8] sm:$0xff]  ;;  %v240_v57 = vld [vmem:[%s836_s16 + $0xf0] sm:$0xff]  ;;  %p623_p1 = por %p622_p13, %p621_p10 }
  0x45   : > { %v261_v52 = vadd.f32 %v846_v1, %v222_v50  ;;  %v223_v54 = vld [vmem:[%s836_s16 + $0x68] sm:$0xff]  ;;  %v278_v55 = vadd.f32 %v846_v1, %v239_v53  ;;  %v224_v58 = vld [vmem:[%s836_s16 + $0x70] sm:$0xff]  ;;  %v279_v59 = vadd.f32 %v846_v1, %v240_v57  ;;  %v241_v61 = vld [vmem:[%s836_s16 + $0xf8] sm:$0xff] }
  0x46   : > { %v262_v56 = vadd.f32 %v846_v1, %v223_v54  ;;  %v263_v60 = vadd.f32 %v846_v1, %v224_v58  ;;  %v225_v62 = vld [vmem:[%s836_s16 + $0x78] sm:$0xff]  ;;  %v280_v63 = vadd.f32 %v846_v1, %v241_v61  ;;  %p624_p3 = pnand %p623_p1, %p617_p0 }
  0x47   : > { %315 = vxpose.xlu1.b32.cont [3/16] %v267_v11, 128  ;;  %v264_v0 = vadd.f32 %v846_v1, %v225_v62 }
  0x48   : > { %283 = vxpose.xlu0.b32.cont [3/16] %v251_v12, 128 }
  0x4b   : > { %316 = vxpose.xlu1.b32.cont [4/16] %v268_v15, 128 }
  0x4c   : > { %284 = vxpose.xlu0.b32.cont [4/16] %v252_v16, 128 }
  0x4f   : > { %317 = vxpose.xlu1.b32.cont [5/16] %v269_v19, 128 }
  0x50   : > { %285 = vxpose.xlu0.b32.cont [5/16] %v253_v20, 128 }
  0x53   : > { %318 = vxpose.xlu1.b32.cont [6/16] %v270_v23, 128 }
  0x54   : > { %286 = vxpose.xlu0.b32.cont [6/16] %v254_v24, 128 }
  0x57   : > { %319 = vxpose.xlu1.b32.cont [7/16] %v271_v27, 128 }
  0x58   : > { %287 = vxpose.xlu0.b32.cont [7/16] %v255_v28, 128 }
  0x5b   : > { %320 = vxpose.xlu1.b32.cont [8/16] %v272_v31, 128 }
  0x5c   : > { %288 = vxpose.xlu0.b32.cont [8/16] %v256_v32, 128 }
  0x5f   : > { %321 = vxpose.xlu1.b32.cont [9/16] %v273_v35, 128 }
  0x60   : > { %289 = vxpose.xlu0.b32.cont [9/16] %v257_v36, 128 }
  0x63   : > { %322 = vxpose.xlu1.b32.cont [10/16] %v274_v39, 128 }
  0x64   : > { %290 = vxpose.xlu0.b32.cont [10/16] %v258_v40, 128 }
  0x67   : > { %323 = vxpose.xlu1.b32.cont [11/16] %v275_v43, 128 }
  0x68   : > { %291 = vxpose.xlu0.b32.cont [11/16] %v259_v44, 128 }
  0x6b   : > { %324 = vxpose.xlu1.b32.cont [12/16] %v276_v47, 128 }
  0x6c   : > { %292 = vxpose.xlu0.b32.cont [12/16] %v260_v48, 128 }
  0x6f   : > { %325 = vxpose.xlu1.b32.cont [13/16] %v277_v51, 128 }
  0x70   : > { %293 = vxpose.xlu0.b32.cont [13/16] %v261_v52, 128 }
  0x73   : > { %326 = vxpose.xlu1.b32.cont [14/16] %v278_v55, 128 }
  0x74   : > { %294 = vxpose.xlu0.b32.cont [14/16] %v262_v56, 128 }
  0x77   : > { %327 = vxpose.xlu1.b32.cont [15/16] %v279_v59, 128 }
  0x78   : > { %295 = vxpose.xlu0.b32.cont [15/16] %v263_v60, 128 }
  0x7b   : > { %328 = vxpose.xlu1.b32.end [16/16] %v280_v63, 128 }
  0x7c   : > { %296 = vxpose.xlu0.b32.end [16/16] %v264_v0, 128 }
  0xbf   : > { %v329_v2 = vpop.trf.xlu1 }
  0xc0   : > { %v297_v3 = vpop.trf.xlu0  ;;  %346 = vst [vmem:[%s913_s21 + $0x8] sm:$0xff] %v329_v2 }
  0xc1   : > { %345 = vst [vmem:[%s913_s21] sm:$0xff] %v297_v3 }
  0xc3   : > { %v330_v1 = vpop.trf.xlu1 }
  0xc4   : > { %v298_v4 = vpop.trf.xlu0  ;;  %348 = vst [vmem:[%s913_s21 + $0x18] sm:$0xff] %v330_v1 }
  0xc5   : > { %347 = vst [vmem:[%s913_s21 + $0x10] sm:$0xff] %v298_v4 }
  0xc7   : > { %v331_v5 = vpop.trf.xlu1 }
  0xc8   : > { %v299_v6 = vpop.trf.xlu0  ;;  %350 = vst [vmem:[%s913_s21 + $0x28] sm:$0xff] %v331_v5 }
  0xc9   : > { %349 = vst [vmem:[%s913_s21 + $0x20] sm:$0xff] %v299_v6 }
  0xcb   : > { %v332_v7 = vpop.trf.xlu1 }
  0xcc   : > { %v300_v8 = vpop.trf.xlu0  ;;  %352 = vst [vmem:[%s913_s21 + $0x38] sm:$0xff] %v332_v7 }
  0xcd   : > { %351 = vst [vmem:[%s913_s21 + $0x30] sm:$0xff] %v300_v8 }
  0xcf   : > { %v333_v9 = vpop.trf.xlu1 }
  0xd0   : > { %v301_v10 = vpop.trf.xlu0  ;;  %354 = vst [vmem:[%s913_s21 + $0x48] sm:$0xff] %v333_v9 }
  0xd1   : > { %353 = vst [vmem:[%s913_s21 + $0x40] sm:$0xff] %v301_v10 }
  0xd3   : > { %v334_v11 = vpop.trf.xlu1 }
  0xd4   : > { %v302_v12 = vpop.trf.xlu0  ;;  %356 = vst [vmem:[%s913_s21 + $0x58] sm:$0xff] %v334_v11 }
  0xd5   : > { %355 = vst [vmem:[%s913_s21 + $0x50] sm:$0xff] %v302_v12 }
  0xd7   : > { %v335_v13 = vpop.trf.xlu1 }
  0xd8   : > { %v303_v14 = vpop.trf.xlu0  ;;  %358 = vst [vmem:[%s913_s21 + $0x68] sm:$0xff] %v335_v13 }
  0xd9   : > { %357 = vst [vmem:[%s913_s21 + $0x60] sm:$0xff] %v303_v14 }
  0xdb   : > { %v336_v15 = vpop.trf.xlu1 }
  0xdc   : > { %v304_v16 = vpop.trf.xlu0  ;;  %360 = vst [vmem:[%s913_s21 + $0x78] sm:$0xff] %v336_v15 }
  0xdd   : > { %359 = vst [vmem:[%s913_s21 + $0x70] sm:$0xff] %v304_v16 }
  0xdf   : > { %v337_v17 = vpop.trf.xlu1 }
  0xe0   : > { %v305_v18 = vpop.trf.xlu0  ;;  %362 = vst [vmem:[%s913_s21 + $0x88] sm:$0xff] %v337_v17 }
  0xe1   : > { %361 = vst [vmem:[%s913_s21 + $0x80] sm:$0xff] %v305_v18 }
  0xe3   : > { %v338_v19 = vpop.trf.xlu1 }
  0xe4   : > { %v306_v20 = vpop.trf.xlu0  ;;  %364 = vst [vmem:[%s913_s21 + $0x98] sm:$0xff] %v338_v19 }
  0xe5   : > { %363 = vst [vmem:[%s913_s21 + $0x90] sm:$0xff] %v306_v20 }
  0xe7   : > { %v339_v21 = vpop.trf.xlu1 }
  0xe8   : > { %v307_v22 = vpop.trf.xlu0  ;;  %366 = vst [vmem:[%s913_s21 + $0xa8] sm:$0xff] %v339_v21 }
  0xe9   : > { %365 = vst [vmem:[%s913_s21 + $0xa0] sm:$0xff] %v307_v22 }
  0xeb   : > { %v340_v23 = vpop.trf.xlu1 }
  0xec   : > { %v308_v24 = vpop.trf.xlu0  ;;  %368 = vst [vmem:[%s913_s21 + $0xb8] sm:$0xff] %v340_v23 }
  0xed   : > { %367 = vst [vmem:[%s913_s21 + $0xb0] sm:$0xff] %v308_v24 }
  0xef   : > { %v341_v25 = vpop.trf.xlu1 }
  0xf0   : > { %v309_v26 = vpop.trf.xlu0  ;;  %370 = vst [vmem:[%s913_s21 + $0xc8] sm:$0xff] %v341_v25 }
  0xf1   : > { %369 = vst [vmem:[%s913_s21 + $0xc0] sm:$0xff] %v309_v26 }
  0xf3   : > { %v342_v27 = vpop.trf.xlu1 }
  0xf4   : > { %v310_v28 = vpop.trf.xlu0  ;;  %372 = vst [vmem:[%s913_s21 + $0xd8] sm:$0xff] %v342_v27 }
  0xf5   : > { %371 = vst [vmem:[%s913_s21 + $0xd0] sm:$0xff] %v310_v28 }
  0xf7   : > { %v343_v29 = vpop.trf.xlu1 }
  0xf8   : > { %v311_v30 = vpop.trf.xlu0  ;;  %374 = vst [vmem:[%s913_s21 + $0xe8] sm:$0xff] %v343_v29 }
  0xf9   : > { %373 = vst [vmem:[%s913_s21 + $0xe0] sm:$0xff] %v311_v30 }
  0xfb   : > { %v344_v31 = vpop.trf.xlu1 }
  0xfc   : > { %v312_v32 = vpop.trf.xlu0  ;;  %376 = vst [vmem:[%s913_s21 + $0xf8] sm:$0xff] %v344_v31 }
  0xfd   : > { %375 = vst [vmem:[%s913_s21 + $0xf0] sm:$0xff] %v312_v32 }
  0xfe   : > { %627 = shalt.err (!%p624_p3)
}
  0xff   : > { %s628_s29 = scalar_lea.hbm %s950_s20, 4096  ;;  %s632_s15 = scalar_lea.hbm %s1005_s2, 8192 }
 0x100   : > { %p629_p4 = scmp.ne.s32.totalorder %s950_s20, %s628_s29  ;;  %p633_p12 = scmp.lt.u32.totalorder %s950_s20, %s1005_s2 }
 0x101   : > { %p634_p2 = scmp.lt.u32.totalorder %s632_s15, %s628_s29  ;;  %p636_p8 = scmp.lt.u32.totalorder %s628_s29, %s950_s20 }
 0x102   : > { %p630_p6 = pnand %p629_p4, %p1012_p9 }
 0x103   : > { %p635_p5 = por %p634_p2, %p633_p12 }
 0x104   : > { %p631_p7 = pneg %p630_p6 }
 0x105   : > { %p637_p11 = por %p636_p8, %p635_p5 }
 0x107   : > { %p638_p0 = pnand %p637_p11, %p631_p7 }
 0x109   : > { %641 = shalt.err (!%p638_p0)
}
 0x10a   : > { %s703_s4 = smov 256   ;;  %s704_s21 = smov 16  }
 0x10b   : > { %519 = dma.vmem_to_hbm [thread:$0]  (%p1012_p9), %s952_s6, 4096, %s950_s20, %s378_s12, %s703_s4, %s703_s4, %s704_s21  }
 0x10c PF: > { %s411_s5 = sand.u32 1, %s676_s9   ;;  %p1013_p10 = scmp.ne.s32.totalorder %s1010_s24, 0 }
 0x10d   : > { %p1014_p13 = scmp.ge.s32.totalorder %s696_s14, 2  ;;  %s412_s18 = scalar_lea.sflag [#allocation4], %s411_s5 }
 0x10f   : > { %p526_p1 = pnand %p1014_p13, %p1013_p10 }
 0x111   : > { %671 = dma.done.wait (!%p526_p1), %s412_s18, 4096  }
 0x112   : > { %673 = vsyncadd (!%p526_p1), %s412_s18, 4294963200  ;;  %s18_s14 = sadd.s32 1, %s696_s14   ;;  %s1015_s9 = smov %s680_s10 }
 0x113   : > { %p15_p3 = scmp.ge.s32.totalorder %s18_s14, 4   ;;  %s1016_s10 = smov %s684_s11 }
 0x114   : > { %s1017_s11 = smov %s776_s23  ;;  %s1018_s12 = smov %s692_s13 }
 0x115   : > { %s1019_s13 = smov %s1021_s17  ;;  %17 = sbr.rel (!%p15_p3) target bundleno = 6 (0x6), region = 76 }
 0x11c   :  { %417 = vsyncpa [#allocation3], 1 }
 0x11d   :  { %419 = vsyncpa [#allocation3 + $0x1], 1 }
 0x11e   :  { %420 = vsyncpa [#allocation4], 1 }
 0x11f   :  { %422 = vsyncpa [#allocation4 + $0x1], 1 }

</bundles_post_ra>
